<compile_context>
chip_gen: v7x
topology: tpu7x:2x2x1
jax: 0.10.0
libtpu: 0.0.40
codegen_flags: <defaults>
</compile_context>

<pallas_src>
import functools

import jax
import jax.numpy as jnp
import numpy as np
from jax import lax
from jax.experimental import pallas as pl
from jax.experimental.pallas import tpu as pltpu


def _round_up(x, m):
    return ((x + m - 1) // m) * m


def _pick_samples_per_block(n, per_sample_bytes):
    """Amortize per-grid-step overhead for tiny samples; keep >=2 steps along N."""
    bsz = 1
    for cand in (2, 4, 8):
        if n % cand == 0 and n // cand >= 2 and cand * per_sample_bytes <= (1 << 20):
            bsz = cand
    return bsz


def _conv_block_kernel(x_ref, w_ref, g_ref, b_ref, o_ref, *scratch,
                       offsets, h_out, wdp, w_out, c_tile, pooling, eps):
    """One grid step = `bsz` samples x one 128-wide channel tile.

    conv (MXU, bf16 operands / f32 acc) + InstanceNorm + ReLU + optional MaxPool.
    """
    bsz = x_ref.shape[0]
    k_dim = x_ref.shape[-1]
    n_rows = h_out * wdp          # full padded width; cols >= w_out are junk

    # ---- 3x3 VALID conv as a few shifted-slice matmuls, f32 accumulate ------
    acc = jnp.zeros((bsz * n_rows, c_tile), jnp.float32)
    for t, off in enumerate(offsets):          # off is static & (fold path) 8-aligned
        xs = x_ref[:, pl.ds(off, n_rows), :]   # (B, n_rows, K) bf16
        xs = xs.reshape(bsz * n_rows, k_dim)   # leading-dim merge: tile-aligned, free
        acc = acc + jnp.dot(xs, w_ref[t], preferred_element_type=jnp.float32)
    # NOTE: conv bias omitted -- cancelled exactly by InstanceNorm's mean subtraction.

    accv = acc.reshape(bsz, h_out, wdp, c_tile)          # (B, H_out, W_pad, C)

    # ---- InstanceNorm2d: masked one-pass stats (junk columns excluded) ------
    col = lax.broadcasted_iota(jnp.int32, (wdp, c_tile), 0)
    valid = col < w_out                                   # broadcasts over (B, H_out)
    inv_cnt = 1.0 / float(h_out * w_out)
    s1 = jnp.sum(jnp.where(valid, accv, 0.0), axis=(1, 2), keepdims=True)
    s2 = jnp.sum(jnp.where(valid, accv * accv, 0.0), axis=(1, 2), keepdims=True)
    mean = s1 * inv_cnt
    var = jnp.maximum(s2 * inv_cnt - mean * mean, 0.0)    # clamp: avoid rsqrt(<0)
    inv = lax.rsqrt(var + eps)                            # EUP
    y = (accv - mean) * (inv * g_ref[...]) + b_ref[...]

    # ---- ReLU ----
    y = jnp.maximum(y, 0.0)

    if pooling:
        ybuf, = scratch
        ph, pw = h_out // 2, w_out // 2
        # Width pair-max via strided VMEM reads (junk columns never touched),
        # height pair-max as a free leading-dim reshape + max in vregs.
        ybuf[...] = y
        hmax = jnp.maximum(ybuf[:, :, pl.ds(0, pw, 2), :],
                           ybuf[:, :, pl.ds(1, pw, 2), :])      # (B, H_out, pw, C)
        hmax = hmax[:, :2 * ph]                                  # drop odd last row
        pooled = jnp.max(hmax.reshape(bsz, ph, 2, pw, c_tile), axis=2)
        o_ref[...] = pooled.astype(o_ref.dtype)
    else:
        # Store full padded width (aligned, unmasked); wrapper slices junk away.
        o_ref[...] = y.astype(o_ref.dtype)


def conv_block(x, w, b, gamma, beta, *, pooling=True, eps=1e-5):
    """x: (N, C_in, H, W); w: (C_out, C_in, 3, 3); b/gamma/beta: (C_out,). NCHW out."""
    n, c_in, h, wd = x.shape
    c_out = w.shape[0]
    h_out, w_out = h - 2, wd - 2
    ph, pw = h_out // 2, w_out // 2

    wdp = _round_up(wd, 8)                 # padded width: aligned flat row offsets
    c_tile = 128                           # lane-dense output / weight tile
    c_pad = _round_up(c_out, c_tile)
    n_ctiles = c_pad // c_tile

    # Channels-last, bf16 MXU operands.
    x_nhwc = jnp.transpose(x, (0, 2, 3, 1)).astype(jnp.bfloat16)

    fold_kw = c_in <= 32                   # K-starved regime: fold kw into K
    if fold_kw:
        # im2col along width: channel block kw holds x[:, i, j+kw, :].
        xp = jnp.pad(x_nhwc, ((0, 0), (0, 0), (0, wdp - wd + 2), (0, 0)))
        x_cat = jnp.concatenate([xp[:, :, k:k + wdp, :] for k in range(3)], axis=-1)
        x_flat = x_cat.reshape(n, h * wdp, 3 * c_in)
        rows_total, k_dim, n_taps = h * wdp, 3 * c_in, 3
        offsets = tuple(kh * wdp for kh in range(3))               # 8-aligned
        w_taps = jnp.transpose(w, (2, 3, 1, 0)).reshape(3, 3 * c_in, c_out)
    else:
        # 9 shifted-slice taps with K=C_in (3x less input traffic for big C_in).
        xp = jnp.pad(x_nhwc, ((0, 0), (0, 1), (0, wdp - wd), (0, 0)))
        x_flat = xp.reshape(n, (h + 1) * wdp, c_in)
        rows_total, k_dim, n_taps = (h + 1) * wdp, c_in, 9
        offsets = tuple(kh * wdp + kw for kh in range(3) for kw in range(3))
        w_taps = jnp.transpose(w, (2, 3, 1, 0)).reshape(9, c_in, c_out)

    # Pad channels to a multiple of 128 (padded channels compute exact zeros).
    w_taps = jnp.pad(w_taps, ((0, 0), (0, 0), (0, c_pad - c_out))).astype(jnp.bfloat16)
    g3 = jnp.pad(gamma.astype(jnp.float32), (0, c_pad - c_out)).reshape(1, 1, c_pad)
    b3 = jnp.pad(beta.astype(jnp.float32), (0, c_pad - c_out)).reshape(1, 1, c_pad)
    del b  # conv bias: mathematically cancelled by InstanceNorm (see kernel note)

    # Samples per grid step (amortize ~0.35us/step overhead for tiny samples).
    bsz = _pick_samples_per_block(n, rows_total * k_dim * 2)

    oh_arr, ow_arr = (ph, pw) if pooling else (h_out, wdp)
    out_itemsize = jnp.dtype(x.dtype).itemsize

    kernel = functools.partial(_conv_block_kernel, offsets=offsets, h_out=h_out,
                               wdp=wdp, w_out=w_out, c_tile=c_tile,
                               pooling=pooling, eps=eps)

    scratch_shapes = []
    if pooling:
        scratch_shapes.append(pltpu.VMEM((bsz, h_out, wdp, c_tile), jnp.float32))

    # Scoped VMEM: raise past v5e's 16 MiB default, stay under v7x's 64 MiB.
    est = (2 * (bsz * rows_total * k_dim * 2
                + n_taps * k_dim * c_tile * 2
                + 2 * c_tile * 4
                + bsz * oh_arr * ow_arr * c_tile * out_itemsize)
           + (bsz * h_out * wdp * c_tile * 4 if pooling else 0))
    vmem_limit = int(min(max(2 * est + (8 << 20), 32 << 20), 60 << 20))

    out_padded = pl.pallas_call(
        kernel,
        out_shape=jax.ShapeDtypeStruct((n, oh_arr, ow_arr, c_pad), x.dtype),
        grid=(n // bsz, n_ctiles),
        in_specs=[
            # x block is revisited across the (inner) channel axis -> no re-DMA.
            pl.BlockSpec((bsz, rows_total, k_dim), lambda i, j: (i, 0, 0)),
            pl.BlockSpec((n_taps, k_dim, c_tile), lambda i, j: (0, 0, j)),
            pl.BlockSpec((1, 1, c_tile), lambda i, j: (0, 0, j)),
            pl.BlockSpec((1, 1, c_tile), lambda i, j: (0, 0, j)),
        ],
        out_specs=pl.BlockSpec((bsz, oh_arr, ow_arr, c_tile),
                               lambda i, j: (i, 0, 0, j)),
        scratch_shapes=scratch_shapes,
        compiler_params=pltpu.CompilerParams(
            dimension_semantics=("parallel", "parallel"),
            vmem_limit_bytes=vmem_limit),
    )(x_flat, w_taps, g3, b3)

    # Layout plumbing back to PyTorch's NCHW (drop channel / width padding).
    out = out_padded[:, :, :, :c_out]
    if not pooling:
        out = out[:, :, :w_out, :]
    return jnp.transpose(out, (0, 3, 1, 2))


def ref_conv_block(x, w, b, gamma, beta, *, pooling=True, eps=1e-5):
    """Pure-JAX reference mirroring the PyTorch module (f32 everywhere)."""
    y = lax.conv_general_dilated(x, w, (1, 1), 'VALID',
                                 dimension_numbers=('NCHW', 'OIHW', 'NCHW'))
    y = y + b[None, :, None, None]
    mean = y.mean(axis=(2, 3), keepdims=True)
    var = ((y - mean) ** 2).mean(axis=(2, 3), keepdims=True)
    y = (y - mean) * lax.rsqrt(var + eps)
    y = y * gamma[None, :, None, None] + beta[None, :, None, None]
    y = jnp.maximum(y, 0.0)
    if pooling:
        y = lax.reduce_window(y, -jnp.inf, lax.max,
                              (1, 1, 2, 2), (1, 1, 2, 2), 'VALID')
    return y


if __name__ == "__main__":
    key = jax.random.PRNGKey(0)

    def make_inputs(k, n, c_in, c_out, h, w):
        k1, k2, k3, k4, k5 = jax.random.split(k, 5)
        x = jax.random.normal(k1, (n, c_in, h, w), jnp.float32)
        bound = 1.0 / float(np.sqrt(c_in * 9))
        wt = jax.random.uniform(k2, (c_out, c_in, 3, 3), jnp.float32, -bound, bound)
        b = jax.random.uniform(k3, (c_out,), jnp.float32, -bound, bound)
        gamma = 1.0 + 0.1 * jax.random.normal(k4, (c_out,), jnp.float32)
        beta = 0.1 * jax.random.normal(k5, (c_out,), jnp.float32)
        return x, wt, b, gamma, beta

    # bf16 MXU operands -> compare against the exact-f32 reference with a
    # bf16-level tolerance.
    TOL = dict(rtol=2e-2, atol=2e-2)

    configs = [
        # (n, c_in, c_out, h, w, pooling)
        (2, 4, 8, 16, 16, True),    # module's demo shape, pooled
        (2, 4, 8, 16, 16, False),   # no-pooling path
        (8, 3, 16, 12, 12, True),   # W % 8 != 0 (width padded), multi-sample blocks
        (2, 48, 32, 8, 8, True),    # C_in > 32 -> 9-tap (no kw-fold) path
    ]
    for idx, (n, c_in, c_out, h, w, pooling) in enumerate(configs):
        x, wt, b, gamma, beta = make_inputs(jax.random.fold_in(key, idx),
                                            n, c_in, c_out, h, w)
        out = jax.block_until_ready(
            conv_block(x, wt, b, gamma, beta, pooling=pooling))
        ref = jax.block_until_ready(
            ref_conv_block(x, wt, b, gamma, beta, pooling=pooling))
        assert out.shape == ref.shape, (out.shape, ref.shape)
        np.testing.assert_allclose(np.asarray(out), np.asarray(ref), **TOL)

    print("KERNEL_OK")
</pallas_src>

<mosaic_0001>
module attributes {stable_mosaic.version = 11 : i64} {
  func.func @_conv_block_kernel(%arg0: i32, %arg1: i32, %arg2: memref<1x256x12xbf16, #tpu.memory_space<vmem>>, %arg3: memref<3x12x128xbf16, #tpu.memory_space<vmem>>, %arg4: memref<1x1x128xf32, #tpu.memory_space<vmem>>, %arg5: memref<1x1x128xf32, #tpu.memory_space<vmem>>, %arg6: memref<1x7x7x128xf32, #tpu.memory_space<vmem>>, %arg7: memref<1x14x16x128xf32, #tpu.memory_space<vmem>>) attributes {dimension_semantics = [#tpu.dimension_semantics<parallel>, #tpu.dimension_semantics<parallel>], iteration_bounds = array<i64: 2, 1>, scalar_prefetch = 0 : i64, scratch_operands = 1 : i64, tpu.core_type = #tpu.core_type<tc>, window_params = [{transform_indices = @transform_0, window_bounds = array<i64: 1, 256, 12>}, {transform_indices = @transform_1, window_bounds = array<i64: 3, 12, 128>}, {transform_indices = @transform_2, window_bounds = array<i64: 1, 1, 128>}, {transform_indices = @transform_3, window_bounds = array<i64: 1, 1, 128>}, {transform_indices = @transform_4, window_bounds = array<i64: 1, 7, 7, 128>}]} {
    %cst = arith.constant 0.000000e+00 : f32
    %0 = vector.broadcast %cst : f32 to vector<224x128xf32>
    %c0 = arith.constant 0 : index
    %c0_0 = arith.constant 0 : index
    %c0_1 = arith.constant 0 : index
    %1 = vector.load %arg2[%c0, %c0_0, %c0_1] : memref<1x256x12xbf16, #tpu.memory_space<vmem>>, vector<1x224x12xbf16>
    %2 = vector.shape_cast %1 : vector<1x224x12xbf16> to vector<224x12xbf16>
    %c0_2 = arith.constant 0 : index
    %c0_3 = arith.constant 0 : index
    %c0_4 = arith.constant 0 : index
    %3 = vector.load %arg3[%c0_2, %c0_3, %c0_4] : memref<3x12x128xbf16, #tpu.memory_space<vmem>>, vector<1x12x128xbf16>
    %4 = vector.shape_cast %3 : vector<1x12x128xbf16> to vector<12x128xbf16>
    %cst_5 = arith.constant dense<0.000000e+00> : vector<224x128xf32>
    %5 = tpu.matmul %2, %4, %cst_5 {dimension_numbers = #tpu.dot_dimension_numbers<[1], [0], [0], [1], [0, 0, 1, 1], [], []>} : vector<224x12xbf16>, vector<12x128xbf16>, vector<224x128xf32> -> vector<224x128xf32>
    %6 = arith.addf %0, %5 : vector<224x128xf32>
    %c0_6 = arith.constant 0 : index
    %c16 = arith.constant 16 : index
    %c0_7 = arith.constant 0 : index
    %7 = vector.load %arg2[%c0_6, %c16, %c0_7] : memref<1x256x12xbf16, #tpu.memory_space<vmem>>, vector<1x224x12xbf16>
    %8 = vector.shape_cast %7 : vector<1x224x12xbf16> to vector<224x12xbf16>
    %c1 = arith.constant 1 : index
    %c0_8 = arith.constant 0 : index
    %c0_9 = arith.constant 0 : index
    %9 = vector.load %arg3[%c1, %c0_8, %c0_9] : memref<3x12x128xbf16, #tpu.memory_space<vmem>>, vector<1x12x128xbf16>
    %10 = vector.shape_cast %9 : vector<1x12x128xbf16> to vector<12x128xbf16>
    %cst_10 = arith.constant dense<0.000000e+00> : vector<224x128xf32>
    %11 = tpu.matmul %8, %10, %cst_10 {dimension_numbers = #tpu.dot_dimension_numbers<[1], [0], [0], [1], [0, 0, 1, 1], [], []>} : vector<224x12xbf16>, vector<12x128xbf16>, vector<224x128xf32> -> vector<224x128xf32>
    %12 = arith.addf %6, %11 : vector<224x128xf32>
    %c0_11 = arith.constant 0 : index
    %c32 = arith.constant 32 : index
    %c0_12 = arith.constant 0 : index
    %13 = vector.load %arg2[%c0_11, %c32, %c0_12] : memref<1x256x12xbf16, #tpu.memory_space<vmem>>, vector<1x224x12xbf16>
    %14 = vector.shape_cast %13 : vector<1x224x12xbf16> to vector<224x12xbf16>
    %c2 = arith.constant 2 : index
    %c0_13 = arith.constant 0 : index
    %c0_14 = arith.constant 0 : index
    %15 = vector.load %arg3[%c2, %c0_13, %c0_14] : memref<3x12x128xbf16, #tpu.memory_space<vmem>>, vector<1x12x128xbf16>
    %16 = vector.shape_cast %15 : vector<1x12x128xbf16> to vector<12x128xbf16>
    %cst_15 = arith.constant dense<0.000000e+00> : vector<224x128xf32>
    %17 = tpu.matmul %14, %16, %cst_15 {dimension_numbers = #tpu.dot_dimension_numbers<[1], [0], [0], [1], [0, 0, 1, 1], [], []>} : vector<224x12xbf16>, vector<12x128xbf16>, vector<224x128xf32> -> vector<224x128xf32>
    %18 = arith.addf %12, %17 : vector<224x128xf32>
    %19 = vector.shape_cast %18 : vector<224x128xf32> to vector<1x14x16x128xf32>
    %20 = tpu.iota {dimensions = array<i32: 0>} : vector<16x128xi32>
    %c14_i32 = arith.constant 14 : i32
    %21 = vector.broadcast %c14_i32 : i32 to vector<16x128xi32>
    %22 = arith.cmpi slt, %20, %21 : vector<16x128xi32>
    %cst_16 = arith.constant 0.000000e+00 : f32
    %23 = vector.shape_cast %22 : vector<16x128xi1> to vector<1x1x16x128xi1>
    %24 = vector.broadcast %23 : vector<1x1x16x128xi1> to vector<1x14x16x128xi1>
    %25 = vector.broadcast %cst_16 : f32 to vector<1x14x16x128xf32>
    %26 = arith.select %24, %19, %25 : vector<1x14x16x128xi1>, vector<1x14x16x128xf32>
    %cst_17 = arith.constant dense<0.000000e+00> : vector<1x128xf32>
    %27 = vector.multi_reduction <add>, %26, %cst_17 [1, 2] : vector<1x14x16x128xf32> to vector<1x128xf32>
    %28 = vector.shape_cast %27 : vector<1x128xf32> to vector<1x1x1x128xf32>
    %29 = arith.mulf %19, %19 : vector<1x14x16x128xf32>
    %cst_18 = arith.constant 0.000000e+00 : f32
    %30 = vector.shape_cast %22 : vector<16x128xi1> to vector<1x1x16x128xi1>
    %31 = vector.broadcast %30 : vector<1x1x16x128xi1> to vector<1x14x16x128xi1>
    %32 = vector.broadcast %cst_18 : f32 to vector<1x14x16x128xf32>
    %33 = arith.select %31, %29, %32 : vector<1x14x16x128xi1>, vector<1x14x16x128xf32>
    %cst_19 = arith.constant dense<0.000000e+00> : vector<1x128xf32>
    %34 = vector.multi_reduction <add>, %33, %cst_19 [1, 2] : vector<1x14x16x128xf32> to vector<1x128xf32>
    %35 = vector.shape_cast %34 : vector<1x128xf32> to vector<1x1x1x128xf32>
    %cst_20 = arith.constant 0.00510204071 : f32
    %36 = vector.broadcast %cst_20 : f32 to vector<1x1x1x128xf32>
    %37 = arith.mulf %28, %36 : vector<1x1x1x128xf32>
    %cst_21 = arith.constant 0.00510204071 : f32
    %38 = vector.broadcast %cst_21 : f32 to vector<1x1x1x128xf32>
    %39 = arith.mulf %35, %38 : vector<1x1x1x128xf32>
    %40 = arith.mulf %37, %37 : vector<1x1x1x128xf32>
    %41 = arith.subf %39, %40 : vector<1x1x1x128xf32>
    %cst_22 = arith.constant 0.000000e+00 : f32
    %42 = vector.broadcast %cst_22 : f32 to vector<1x1x1x128xf32>
    %43 = arith.maximumf %41, %42 : vector<1x1x1x128xf32>
    %cst_23 = arith.constant 9.99999974E-6 : f32
    %44 = vector.broadcast %cst_23 : f32 to vector<1x1x1x128xf32>
    %45 = arith.addf %43, %44 : vector<1x1x1x128xf32>
    %46 = math.rsqrt %45 : vector<1x1x1x128xf32>
    %47 = vector.broadcast %37 : vector<1x1x1x128xf32> to vector<1x14x16x128xf32>
    %48 = arith.subf %19, %47 : vector<1x14x16x128xf32>
    %c0_24 = arith.constant 0 : index
    %c0_25 = arith.constant 0 : index
    %c0_26 = arith.constant 0 : index
    %49 = vector.load %arg4[%c0_24, %c0_25, %c0_26] : memref<1x1x128xf32, #tpu.memory_space<vmem>>, vector<1x1x128xf32>
    %50 = vector.shape_cast %49 : vector<1x1x128xf32> to vector<1x1x1x128xf32>
    %51 = arith.mulf %46, %50 : vector<1x1x1x128xf32>
    %52 = vector.broadcast %51 : vector<1x1x1x128xf32> to vector<1x14x16x128xf32>
    %53 = arith.mulf %48, %52 : vector<1x14x16x128xf32>
    %c0_27 = arith.constant 0 : index
    %c0_28 = arith.constant 0 : index
    %c0_29 = arith.constant 0 : index
    %54 = vector.load %arg5[%c0_27, %c0_28, %c0_29] : memref<1x1x128xf32, #tpu.memory_space<vmem>>, vector<1x1x128xf32>
    %55 = vector.shape_cast %54 : vector<1x1x128xf32> to vector<1x1x1x128xf32>
    %56 = vector.broadcast %55 : vector<1x1x1x128xf32> to vector<1x14x16x128xf32>
    %57 = arith.addf %53, %56 : vector<1x14x16x128xf32>
    %cst_30 = arith.constant 0.000000e+00 : f32
    %58 = vector.broadcast %cst_30 : f32 to vector<1x14x16x128xf32>
    %59 = arith.maximumf %57, %58 : vector<1x14x16x128xf32>
    %c0_31 = arith.constant 0 : index
    %c0_32 = arith.constant 0 : index
    %c0_33 = arith.constant 0 : index
    %c0_34 = arith.constant 0 : index
    %60 = vector.load %arg7[%c0_31, %c0_32, %c0_33, %c0_34] : memref<1x14x16x128xf32, #tpu.memory_space<vmem>>, vector<1x14x16x128xf32>
    tpu.vector_store %arg7[%c0_31, %c0_32, %c0_33, %c0_34], %59 {strides = array<i32>} : memref<1x14x16x128xf32, #tpu.memory_space<vmem>>, vector<1x14x16x128xf32>,
    %c0_35 = arith.constant 0 : index
    %c0_36 = arith.constant 0 : index
    %c0_37 = arith.constant 0 : index
    %c0_38 = arith.constant 0 : index
    %61 = tpu.strided_load %arg7[%c0_35, %c0_36, %c0_37, %c0_38] {strides = array<i32: 1, 1, 2, 1>} : memref<1x14x16x128xf32, #tpu.memory_space<vmem>>, vector<1x14x7x128xf32>
    %c0_39 = arith.constant 0 : index
    %c0_40 = arith.constant 0 : index
    %c1_41 = arith.constant 1 : index
    %c0_42 = arith.constant 0 : index
    %62 = tpu.strided_load %arg7[%c0_39, %c0_40, %c1_41, %c0_42] {strides = array<i32: 1, 1, 2, 1>} : memref<1x14x16x128xf32, #tpu.memory_space<vmem>>, vector<1x14x7x128xf32>
    %63 = arith.maximumf %61, %62 : vector<1x14x7x128xf32>
    %64 = vector.shape_cast %63 : vector<1x14x7x128xf32> to vector<1x7x2x7x128xf32>
    %cst_43 = arith.constant dense<0xFF800000> : vector<1x7x7x128xf32>
    %65 = vector.multi_reduction <maximumf>, %64, %cst_43 [2] : vector<1x7x2x7x128xf32> to vector<1x7x7x128xf32>
    %c0_44 = arith.constant 0 : index
    %c0_45 = arith.constant 0 : index
    %c0_46 = arith.constant 0 : index
    %c0_47 = arith.constant 0 : index
    %66 = vector.load %arg6[%c0_44, %c0_45, %c0_46, %c0_47] : memref<1x7x7x128xf32, #tpu.memory_space<vmem>>, vector<1x7x7x128xf32>
    tpu.vector_store %arg6[%c0_44, %c0_45, %c0_46, %c0_47], %65 {strides = array<i32>} : memref<1x7x7x128xf32, #tpu.memory_space<vmem>>, vector<1x7x7x128xf32>,
    return
  }
  func.func @transform_0(%arg0: i32, %arg1: i32) -> (i32, i32, i32) {
    %c0_i32 = arith.constant 0 : i32
    %c0_i32_0 = arith.constant 0 : i32
    %c0_i32_1 = arith.constant 0 : i32
    return %arg0, %c0_i32, %c0_i32_0 : i32, i32, i32
  }
  func.func @transform_1(%arg0: i32, %arg1: i32) -> (i32, i32, i32) {
    %c0_i32 = arith.constant 0 : i32
    %c0_i32_0 = arith.constant 0 : i32
    %c0_i32_1 = arith.constant 0 : i32
    return %c0_i32, %c0_i32_0, %arg1 : i32, i32, i32
  }
  func.func @transform_2(%arg0: i32, %arg1: i32) -> (i32, i32, i32) {
    %c0_i32 = arith.constant 0 : i32
    %c0_i32_0 = arith.constant 0 : i32
    %c0_i32_1 = arith.constant 0 : i32
    return %c0_i32, %c0_i32_0, %arg1 : i32, i32, i32
  }
  func.func @transform_3(%arg0: i32, %arg1: i32) -> (i32, i32, i32) {
    %c0_i32 = arith.constant 0 : i32
    %c0_i32_0 = arith.constant 0 : i32
    %c0_i32_1 = arith.constant 0 : i32
    return %c0_i32, %c0_i32_0, %arg1 : i32, i32, i32
  }
  func.func @transform_4(%arg0: i32, %arg1: i32) -> (i32, i32, i32, i32) {
    %c0_i32 = arith.constant 0 : i32
    %c0_i32_0 = arith.constant 0 : i32
    %c0_i32_1 = arith.constant 0 : i32
    return %arg0, %c0_i32, %c0_i32_0, %arg1 : i32, i32, i32, i32
  }
}

</mosaic_0001>

<bundles_post_ra>
// kernel: tpu_custom_call.1
= control target key start
LH: loop header
LB: loop body
LE: loop exit
PB: predicated region body
PF: predicated region fallthrough
CT: control target
= control target key end

     0   :  { %s1983_s15 = smov 0   ;;  %s1985_s16 = smov 0   ;;  %s2406_s0 = inlined_call_operand.vmem [shape: bf16[2,256,12], index: 0, kind: input, shape index: {}]   ;;  %s2407_s1 = inlined_call_operand.vmem [shape: bf16[3,12,128], index: 1, kind: input, shape index: {}]   ;;  %s2408_s2 = inlined_call_operand.vmem [shape: f32[1,1,128], index: 2, kind: input, shape index: {}]   ;;  %s2409_s3 = inlined_call_operand.vmem [shape: f32[1,1,128], index: 3, kind: input, shape index: {}]   ;;  %s2410_s4 = inlined_call_operand.vmem [shape: f32[2,7,7,128], index: 4, kind: output, shape index: {}]  }
   0x1   :  { %s1987_s17 = smov 0  }
   0x2 LB: > { %s26_s18 = sadd.s32 1, %s1952_s16  ;;  %p1592_p0 = scmp.ge.s32.totalorder %s1956_s17, 1  ;;  %s1956_s17 = sphi %s1987_s17, %s14_s17   ;;  %s1952_s16 = sphi %s1985_s16, %s2412_s16   ;;  %s1948_s15 = sphi %s1983_s15, %s2411_s15  }
   0x3   : > { %p28_p1 = scmp.ge.s32.totalorder %s26_s18, 2  ;;  %p201_p2 = scmp.lt.s32.totalorder %s1956_s17, 3 }
   0x5   : > { %s2414_s18 = smov (%p28_p1, %s26_s18), 0  ;;  %p202_p3 = pnand %p1592_p0, %p201_p2 }
   0x6   : > { %vm417_vm0 = vcmask (!%p202_p3), 1045504   ;;  %p240_p4 = scmp.lt.s32.totalorder (!%p202_p3), %s1948_s15, 1  ;;  %v1900_v0 = vld [vmem:[%s2407_s1] sm:$0x3f] (!%p202_p3)   ;;  %v1901_v1 = vld [vmem:[%s2407_s1 + $0x8] sm:$0x3f] (!%p202_p3)   ;;  %v1051_v47 = vlaneseq (!%p202_p3) }
   0x7   : > { %205 = sbr.rel (%p202_p3) target bundleno = 409 (0x199), region = 36  ;;  %1872 = vmatprep.subr.msk.bf16.mxu0 (!%p202_p3), %vm417_vm0, %v1900_v0  ;;  %v580_v2 = vsel (!%p202_p3), %vm417_vm0, %v1900_v0, 0  ;;  %v1904_v3 = vld [vmem:[%s2407_s1 + $0x10] sm:$0x3f] (!%p202_p3)   ;;  %1871 = vmatprep.subr.msk.bf16.mxu1 (!%p202_p3), %vm417_vm0, %v1901_v1  ;;  %v419_v4 = vsel (!%p202_p3), %vm417_vm0, %v1901_v1, 0  ;;  %vm374_vm1 = vcmask (!%p202_p3), 97280  }
   0x8   : > { %1754 = vmatpush3.bf16.msra.mxu0 (!%p202_p3), %v580_v2  ;;  %1724 = vmatpush3.bf16.msra.mxu1 (!%p202_p3), %v419_v4  ;;  %v876_v8 = vsel (!%p202_p3), %vm417_vm0, %v1904_v3, 0  ;;  %v2104_v52 = vshrl.u32 (!%p202_p3), %v1051_v47, 7  ;;  %vm1439_vm3 = vcmask (!%p202_p3), 1046528  }
   0x9   : > { %1874 = vmatprep.subr.msk.bf16.mxu0 (!%p202_p3), %vm417_vm0, %v1904_v3  ;;  %1873 = vmatprep.subr.msk.bf16.mxu1 (!%p202_p3), %vm417_vm0, %v1900_v0 }
   0xa   : > { %v2107_v53 = vadd.s32 (!%p202_p3), 8, %v2104_v52 }
   0xc   : > { %vm1055_vm2 = vcmp.lt.s32.totalorder (!%p202_p3), %v2107_v53, 14 }
   0xe   : > { %s2416_s15 = smov (!%p240_p4, %s1948_s15), 1 }
   0xf   : > { %s1677_s25 = sshll.u32 %s2416_s15, 7  ;;  %s1875_s7 = smul.u32 56, %s2416_s15 }
  0x10   : > { %s2020_s28 = scalar_lea.vmem %s2406_s0, %s1677_s25 }
  0x11   : > { %v1902_v5 = vld [vmem:[%s2020_s28 + $0x8] sm:$0xff]   ;;  %v1903_v6 = vld [vmem:[%s2020_s28] sm:$0xff]   ;;  %v1905_v7 = vld [vmem:[%s2020_s28 + $0x10] sm:$0xff]   ;;  %s262_s10 = scalar_lea.vmem %s2410_s4, %s1875_s7 }
  0x12   : > { %1725 = vmatprep.mubr.msk.bf16.mxu1 %vm374_vm1, %v1902_v5  ;;  %1755 = vmatprep.mubr.msk.bf16.mxu0 %vm374_vm1, %v1903_v6  ;;  %v1906_v9 = vld [vmem:[%s2020_s28 + $0x18] sm:$0xff]   ;;  %v1907_v10 = vld [vmem:[%s2020_s28 + $0x20] sm:$0xff]   ;;  %v1908_v11 = vld [vmem:[%s2020_s28 + $0x28] sm:$0xff]  }
  0x13   : > { %1726 = vmatmul.mubr.msk.bf16.vlgmr.msra.gmra.mrb[0].mxu1 %vm374_vm1, %v1905_v7  ;;  %1756 = vmatmul.mubr.msk.bf16.vlgmr.msra.gmra.mrb[0].mxu0 %vm374_vm1, %v1902_v5  ;;  %v1909_v12 = vld [vmem:[%s2020_s28 + $0x30] sm:$0xff]   ;;  %v1910_v13 = vld [vmem:[%s2020_s28 + $0x38] sm:$0xff]   ;;  %v1911_v14 = vld [vmem:[%s2020_s28 + $0x40] sm:$0xff]  }
  0x14   : > { %1784 = vmatpush3.bf16.msra.mxu0 %v876_v8  ;;  %1729 = vmatprep.mubr.msk.bf16.mxu1 %vm374_vm1, %v1906_v9  ;;  %v1912_v15 = vld [vmem:[%s2020_s28 + $0x48] sm:$0xff]   ;;  %v1913_v16 = vld [vmem:[%s2020_s28 + $0x10] sm:$0xff]   ;;  %v1915_v18 = vld [vmem:[%s2020_s28 + $0x18] sm:$0xff]  }
  0x15   : > { %1759 = vmatprep.mubr.msk.bf16.mxu0 %vm374_vm1, %v1905_v7  ;;  %1814 = vmatpush3.bf16.msra.mxu1 %v580_v2  ;;  %v1914_v17 = vld [vmem:[%s2020_s28 + $0x50] sm:$0xff]   ;;  %v1916_v19 = vld [vmem:[%s2020_s28 + $0x58] sm:$0xff]   ;;  %v1917_v20 = vld [vmem:[%s2020_s28 + $0x20] sm:$0xff]  }
  0x16   : > { %v1918_v21 = vld [vmem:[%s2020_s28 + $0x60] sm:$0xff]   ;;  %v1919_v22 = vld [vmem:[%s2020_s28 + $0x28] sm:$0xff]   ;;  %v1921_v24 = vld [vmem:[%s2020_s28 + $0x30] sm:$0xff]  }
  0x17   : > { %v1920_v23 = vld [vmem:[%s2020_s28 + $0x68] sm:$0xff]   ;;  %v1922_v25 = vld [vmem:[%s2020_s28 + $0x70] sm:$0xff]   ;;  %v1923_v26 = vld [vmem:[%s2020_s28 + $0x38] sm:$0xff]  }
  0x18   : > { %v1924_v27 = vld [vmem:[%s2020_s28 + $0x40] sm:$0xff]   ;;  %v1925_v28 = vld [vmem:[%s2020_s28 + $0x48] sm:$0xff]   ;;  %v1926_v29 = vld [vmem:[%s2020_s28 + $0x50] sm:$0xff]  }
  0x19   : > { %v1927_v30 = vld [vmem:[%s2020_s28 + $0x58] sm:$0xff]   ;;  %v1928_v31 = vld [vmem:[%s2020_s28 + $0x60] sm:$0xff]   ;;  %v1929_v32 = vld [vmem:[%s2020_s28 + $0x68] sm:$0xff]  }
  0x1a   : > { %v1930_v33 = vld [vmem:[%s2020_s28 + $0x70] sm:$0xff]   ;;  %v1931_v34 = vld [vmem:[%s2020_s28 + $0x78] sm:$0xff]  }
  0x1b   : > { %1730 = vmatmul.mubr.msk.bf16.gmra.mrb[4].mxu1 %vm374_vm1, %v1907_v10  ;;  %1760 = vmatmul.mubr.msk.bf16.gmra.mrb[4].mxu0 %vm374_vm1, %v1906_v9 }
  0x1c   : > { %1733 = vmatprep.mubr.msk.bf16.mxu1 %vm374_vm1, %v1908_v11  ;;  %1763 = vmatprep.mubr.msk.bf16.mxu0 %vm374_vm1, %v1907_v10 }
  0x23   : > { %1734 = vmatmul.mubr.msk.bf16.gmra.mrb[8].mxu1 %vm374_vm1, %v1909_v12  ;;  %1764 = vmatmul.mubr.msk.bf16.gmra.mrb[8].mxu0 %vm374_vm1, %v1908_v11 }
  0x24   : > { %1737 = vmatprep.mubr.msk.bf16.mxu1 %vm374_vm1, %v1910_v13  ;;  %1767 = vmatprep.mubr.msk.bf16.mxu0 %vm374_vm1, %v1909_v12 }
  0x2b   : > { %1738 = vmatmul.mubr.msk.bf16.gmra.mrb[12].mxu1 %vm374_vm1, %v1911_v14  ;;  %1768 = vmatmul.mubr.msk.bf16.gmra.mrb[12].mxu0 %vm374_vm1, %v1910_v13 }
  0x2c   : > { %1741 = vmatprep.mubr.msk.bf16.mxu1 %vm374_vm1, %v1912_v15  ;;  %1785 = vmatprep.mubr.msk.bf16.mxu0 %vm374_vm1, %v1913_v16 }
  0x33   : > { %1742 = vmatmul.mubr.msk.bf16.gmra.mrb[16].mxu1 %vm374_vm1, %v1914_v17  ;;  %1786 = vmatmul.mubr.msk.bf16.vlgmr.msra.gmra.mrb[0].mxu0 %vm374_vm1, %v1915_v18 }
  0x34   : > { %1745 = vmatprep.mubr.msk.bf16.mxu1 %vm374_vm1, %v1916_v19  ;;  %1789 = vmatprep.mubr.msk.bf16.mxu0 %vm374_vm1, %v1917_v20 }
  0x3b   : > { %1746 = vmatmul.mubr.msk.bf16.gmra.mrb[20].mxu1 %vm374_vm1, %v1918_v21  ;;  %1790 = vmatmul.mubr.msk.bf16.gmra.mrb[4].mxu0 %vm374_vm1, %v1919_v22 }
  0x3c   : > { %1749 = vmatprep.mubr.msk.bf16.mxu1 %vm374_vm1, %v1920_v23  ;;  %1793 = vmatprep.mubr.msk.bf16.mxu0 %vm374_vm1, %v1921_v24 }
  0x43   : > { %1750 = vmatmul.mubr.msk.bf16.gmra.mrb[24].mxu1 %vm374_vm1, %v1922_v25  ;;  %1794 = vmatmul.mubr.msk.bf16.gmra.mrb[8].mxu0 %vm374_vm1, %v1923_v26 }
  0x44   : > { %1771 = vmatprep.mubr.msk.bf16.mxu1 %vm374_vm1, %v1911_v14  ;;  %1797 = vmatprep.mubr.msk.bf16.mxu0 %vm374_vm1, %v1924_v27 }
  0x4b   : > { %1772 = vmatmul.mubr.msk.bf16.vlgmr.msra.gmra.mrb[16].mxu1 %vm374_vm1, %v1912_v15  ;;  %1798 = vmatmul.mubr.msk.bf16.gmra.mrb[12].mxu0 %vm374_vm1, %v1925_v28 }
  0x4c   : > { %1775 = vmatprep.mubr.msk.bf16.mxu1 %vm374_vm1, %v1914_v17  ;;  %1801 = vmatprep.mubr.msk.bf16.mxu0 %vm374_vm1, %v1926_v29 }
  0x53   : > { %1776 = vmatmul.mubr.msk.bf16.gmra.mrb[20].mxu1 %vm374_vm1, %v1916_v19  ;;  %1802 = vmatmul.mubr.msk.bf16.gmra.mrb[16].mxu0 %vm374_vm1, %v1927_v30 }
  0x54   : > { %1779 = vmatprep.mubr.msk.bf16.mxu1 %vm374_vm1, %v1918_v21  ;;  %1805 = vmatprep.mubr.msk.bf16.mxu0 %vm374_vm1, %v1928_v31 }
  0x5b   : > { %1780 = vmatmul.mubr.msk.bf16.gmra.mrb[24].mxu1 %vm374_vm1, %v1920_v23  ;;  %1806 = vmatmul.mubr.msk.bf16.gmra.mrb[20].mxu0 %vm374_vm1, %v1929_v32 }
  0x5c   : > { %1809 = vmatprep.mubr.msk.bf16.mxu0 %vm374_vm1, %v1930_v33 }
  0x63   : > { %1810 = vmatmul.mubr.msk.bf16.gmra.mrb[24].mxu0 %vm374_vm1, %v1931_v34 }
  0xe6   : > { %v1727_v35 = vpop.f32.mrb[0].mxu1 }
  0xe7   : > { %v455_v36 = vpop.f32.mrb[1].mxu1 }
  0xe8   : > { %v1728_v37 = vpop.f32.mrb[2].mxu1 }
  0xe9   : > { %v458_v38 = vpop.f32.mrb[3].mxu1 }
  0xee   : > { %v1731_v39 = vpop.f32.mrb[4].mxu1 }
  0xef   : > { %v471_v40 = vpop.f32.mrb[5].mxu1 }
  0xf0   : > { %v1732_v41 = vpop.f32.mrb[6].mxu1 }
  0xf1   : > { %v474_v42 = vpop.f32.mrb[7].mxu1 }
  0xf6   : > { %v1735_v43 = vpop.f32.mrb[8].mxu1 }
  0xf7   : > { %v487_v44 = vpop.f32.mrb[9].mxu1 }
  0xf8   : > { %v1736_v45 = vpop.f32.mrb[10].mxu1 }
  0xf9   : > { %v490_v46 = vpop.f32.mrb[11].mxu1 }
  0xfe   : > { %v2096_v48 = vpop.f32.mrb[12].mxu1 }
  0xff   : > { %v2098_v49 = vpop.f32.mrb[13].mxu1 }
 0x100   : > { %v2100_v50 = vpop.f32.mrb[14].mxu1 }
 0x101   : > { %v2102_v51 = vpop.f32.mrb[15].mxu1 }
 0x106   : > { %v1787_v54 = vpop.f32.mrb[0].mxu0 }
 0x107   : > { %v2109_v55 = vadd.f32 %v1787_v54, %v1727_v35  ;;  %v912_v56 = vpop.f32.mrb[1].mxu0 }
 0x108   : > { %v2111_v57 = vadd.f32 %v912_v56, %v455_v36  ;;  %v1788_v58 = vpop.f32.mrb[2].mxu0 }
 0x109   : > { %v2113_v59 = vadd.f32 %v1788_v58, %v1728_v37  ;;  %v915_v60 = vpop.f32.mrb[3].mxu0  ;;  %v1123_v5 = vmul.f32 %v2109_v55, %v2109_v55 }
 0x10a   : > { %v2116_v61 = vadd.f32 %v915_v60, %v458_v38  ;;  %v1121_v0 = vmul.f32 %v2111_v57, %v2111_v57 }
 0x10b   : > { %v1124_v2 = vmul.f32 %v2113_v59, %v2113_v59  ;;  %v1063_v10 = vsel %vm1055_vm2, %v2113_v59, 0.0 }
 0x10c   : > { %v1061_v62 = vsel %vm1055_vm2, %v2116_v61, 0.0  ;;  %v1122_v63 = vmul.f32 %v2116_v61, %v2116_v61 }
 0x10d   : > { %v1088_v1 = vadd.f32 %v2111_v57, %v1061_v62  ;;  %v1152_v17 = vsel %vm1055_vm2, %v1124_v2, 0.0 }
 0x10e   : > { %v1150_v3 = vsel %vm1055_vm2, %v1122_v63, 0.0  ;;  %v1791_v4 = vpop.f32.mrb[4].mxu0 }
 0x10f   : > { %v1089_v6 = vadd.f32 %v2109_v55, %v1088_v1  ;;  %v1177_v7 = vadd.f32 %v1150_v3, %v1121_v0  ;;  %v2133_v8 = vadd.f32 %v1791_v4, %v1731_v39  ;;  %v928_v9 = vpop.f32.mrb[5].mxu0 }
 0x110   : > { %v2138_v11 = vadd.f32 %v928_v9, %v471_v40  ;;  %v1792_v12 = vpop.f32.mrb[6].mxu0 }
 0x111   : > { %v1178_v13 = vadd.f32 %v1177_v7, %v1123_v5  ;;  %v1090_v14 = vadd.f32 %v1089_v6, %v1063_v10  ;;  %v2140_v15 = vadd.f32 %v1792_v12, %v1732_v41  ;;  %v931_v16 = vpop.f32.mrb[7].mxu0  ;;  %v1127_v29 = vmul.f32 %v2133_v8, %v2133_v8 }
 0x112   : > { %v1125_v18 = vmul.f32 %v2138_v11, %v2138_v11  ;;  %v2146_v19 = vadd.f32 %v931_v16, %v474_v42 }
 0x113   : > { %v1091_v20 = vadd.f32 %v2138_v11, %v1090_v14  ;;  %v1179_v21 = vadd.f32 %v1178_v13, %v1152_v17  ;;  %v1128_v26 = vmul.f32 %v2140_v15, %v2140_v15  ;;  %v1067_v34 = vsel %vm1055_vm2, %v2140_v15, 0.0 }
 0x114   : > { %v1065_v22 = vsel %vm1055_vm2, %v2146_v19, 0.0  ;;  %v1126_v23 = vmul.f32 %v2146_v19, %v2146_v19 }
 0x115   : > { %v1180_v24 = vadd.f32 %v1179_v21, %v1125_v18  ;;  %v1092_v25 = vadd.f32 %v1091_v20, %v1065_v22  ;;  %v1156_v41 = vsel %vm1055_vm2, %v1128_v26, 0.0 }
 0x116   : > { %v1154_v27 = vsel %vm1055_vm2, %v1126_v23, 0.0  ;;  %v1795_v28 = vpop.f32.mrb[8].mxu0 }
 0x117   : > { %v1093_v30 = vadd.f32 %v2133_v8, %v1092_v25  ;;  %v1181_v31 = vadd.f32 %v1180_v24, %v1154_v27  ;;  %v2161_v32 = vadd.f32 %v1795_v28, %v1735_v43  ;;  %v944_v33 = vpop.f32.mrb[9].mxu0 }
 0x118   : > { %v2166_v35 = vadd.f32 %v944_v33, %v487_v44  ;;  %v1796_v36 = vpop.f32.mrb[10].mxu0 }
 0x119   : > { %v1182_v37 = vadd.f32 %v1181_v31, %v1127_v29  ;;  %v1094_v38 = vadd.f32 %v1093_v30, %v1067_v34  ;;  %v2168_v39 = vadd.f32 %v1796_v36, %v1736_v45  ;;  %v947_v40 = vpop.f32.mrb[11].mxu0  ;;  %v1131_v0 = vmul.f32 %v2161_v32, %v2161_v32 }
 0x11a   : > { %v1129_v42 = vmul.f32 %v2166_v35, %v2166_v35  ;;  %v2174_v43 = vadd.f32 %v947_v40, %v490_v46 }
 0x11b   : > { %v1095_v47 = vadd.f32 %v2166_v35, %v1094_v38  ;;  %v1183_v54 = vadd.f32 %v1182_v37, %v1156_v41  ;;  %v1132_v60 = vmul.f32 %v2168_v39, %v2168_v39  ;;  %v1071_v6 = vsel %vm1055_vm2, %v2168_v39, 0.0 }
 0x11c   : > { %v1069_v44 = vsel %vm1055_vm2, %v2174_v43, 0.0  ;;  %v1130_v45 = vmul.f32 %v2174_v43, %v2174_v43 }
 0x11d   : > { %v1184_v56 = vadd.f32 %v1183_v54, %v1129_v42  ;;  %v1096_v58 = vadd.f32 %v1095_v47, %v1069_v44 }
 0x11e   : > { %v1158_v62 = vsel %vm1055_vm2, %v1130_v45, 0.0  ;;  %v1773_v46 = vpop.f32.mrb[16].mxu1  ;;  %v1799_v63 = vpop.f32.mrb[12].mxu0 }
 0x11f   : > { %v1097_v1 = vadd.f32 %v2161_v32, %v1096_v58  ;;  %v1185_v2 = vadd.f32 %v1184_v56, %v1158_v62  ;;  %v2190_v3 = vadd.f32 %v1799_v63, %v2096_v48  ;;  %v680_v4 = vpop.f32.mrb[17].mxu1  ;;  %v960_v5 = vpop.f32.mrb[13].mxu0  ;;  %v1160_v48 = vsel %vm1055_vm2, %v1132_v60, 0.0 }
 0x120   : > { %v2196_v7 = vadd.f32 %v960_v5, %v2098_v49  ;;  %v1774_v9 = vpop.f32.mrb[18].mxu1  ;;  %v1800_v10 = vpop.f32.mrb[14].mxu0 }
 0x121   : > { %v1186_v12 = vadd.f32 %v1185_v2, %v1131_v0  ;;  %v1098_v13 = vadd.f32 %v1097_v1, %v1071_v6  ;;  %v2199_v14 = vadd.f32 %v1800_v10, %v2100_v50  ;;  %v683_v16 = vpop.f32.mrb[19].mxu1  ;;  %v963_v17 = vpop.f32.mrb[15].mxu0  ;;  %v1135_v28 = vmul.f32 %v2190_v3, %v2190_v3 }
 0x122   : > { %v1133_v18 = vmul.f32 %v2196_v7, %v2196_v7  ;;  %v2206_v20 = vadd.f32 %v963_v17, %v2102_v51 }
 0x123   : > { %v1099_v49 = vadd.f32 %v2196_v7, %v1098_v13  ;;  %v1187_v21 = vadd.f32 %v1186_v12, %v1160_v48  ;;  %v1136_v25 = vmul.f32 %v2199_v14, %v2199_v14  ;;  %v1075_v36 = vsel %vm1055_vm2, %v2199_v14, 0.0 }
 0x124   : > { %v1073_v22 = vsel %vm1055_vm2, %v2206_v20, 0.0  ;;  %v1134_v50 = vmul.f32 %v2206_v20, %v2206_v20 }
 0x125   : > { %v1188_v23 = vadd.f32 %v1187_v21, %v1133_v18  ;;  %v1100_v24 = vadd.f32 %v1099_v49, %v1073_v22  ;;  %v1164_v45 = vsel %vm1055_vm2, %v1136_v25, 0.0 }
 0x126   : > { %v1162_v26 = vsel %vm1055_vm2, %v1134_v50, 0.0  ;;  %v1777_v51 = vpop.f32.mrb[20].mxu1  ;;  %v1803_v27 = vpop.f32.mrb[16].mxu0 }
 0x127   : > { %v1101_v29 = vadd.f32 %v2190_v3, %v1100_v24  ;;  %v1189_v30 = vadd.f32 %v1188_v23, %v1162_v26  ;;  %v2221_v31 = vadd.f32 %v1803_v27, %v1773_v46  ;;  %v696_v33 = vpop.f32.mrb[21].mxu1  ;;  %v976_v34 = vpop.f32.mrb[17].mxu0 }
 0x128   : > { %v2226_v37 = vadd.f32 %v976_v34, %v680_v4  ;;  %v1778_v38 = vpop.f32.mrb[22].mxu1  ;;  %v1804_v40 = vpop.f32.mrb[18].mxu0 }
 0x129   : > { %v1190_v41 = vadd.f32 %v1189_v30, %v1135_v28  ;;  %v1102_v42 = vadd.f32 %v1101_v29, %v1075_v36  ;;  %v2228_v47 = vadd.f32 %v1804_v40, %v1774_v9  ;;  %v699_v54 = vpop.f32.mrb[23].mxu1  ;;  %v979_v44 = vpop.f32.mrb[19].mxu0  ;;  %v1139_v9 = vmul.f32 %v2221_v31, %v2221_v31 }
 0x12a   : > { %v1137_v56 = vmul.f32 %v2226_v37, %v2226_v37  ;;  %v2234_v58 = vadd.f32 %v979_v44, %v683_v16 }
 0x12b   : > { %v1103_v60 = vadd.f32 %v2226_v37, %v1102_v42  ;;  %v1191_v62 = vadd.f32 %v1190_v41, %v1164_v45  ;;  %v1140_v2 = vmul.f32 %v2228_v47, %v2228_v47  ;;  %v1079_v48 = vsel %vm1055_vm2, %v2228_v47, 0.0 }
 0x12c   : > { %v1077_v46 = vsel %vm1055_vm2, %v2234_v58, 0.0  ;;  %v1138_v63 = vmul.f32 %v2234_v58, %v2234_v58 }
 0x12d   : > { %v1192_v0 = vadd.f32 %v1191_v62, %v1137_v56  ;;  %v1104_v1 = vadd.f32 %v1103_v60, %v1077_v46  ;;  %v1168_v26 = vsel %vm1055_vm2, %v1140_v2, 0.0 }
 0x12e   : > { %v1166_v4 = vsel %vm1055_vm2, %v1138_v63, 0.0  ;;  %v1781_v5 = vpop.f32.mrb[24].mxu1  ;;  %v1807_v6 = vpop.f32.mrb[20].mxu0 }
 0x12f   : > { %v1105_v10 = vadd.f32 %v2221_v31, %v1104_v1  ;;  %v1193_v12 = vadd.f32 %v1192_v0, %v1166_v4  ;;  %v2249_v13 = vadd.f32 %v1807_v6, %v1777_v51  ;;  %v712_v16 = vpop.f32.mrb[25].mxu1  ;;  %v992_v17 = vpop.f32.mrb[21].mxu0 }
 0x130   : > { %v2254_v18 = vadd.f32 %v992_v17, %v696_v33  ;;  %v1782_v49 = vpop.f32.mrb[26].mxu1  ;;  %v1808_v21 = vpop.f32.mrb[22].mxu0 }
 0x131   : > { %v1194_v22 = vadd.f32 %v1193_v12, %v1139_v9  ;;  %v1106_v50 = vadd.f32 %v1105_v10, %v1079_v48  ;;  %v2256_v23 = vadd.f32 %v1808_v21, %v1778_v38  ;;  %v715_v24 = vpop.f32.mrb[27].mxu1  ;;  %v995_v25 = vpop.f32.mrb[23].mxu0  ;;  %v1143_v42 = vmul.f32 %v2249_v13, %v2249_v13 }
 0x132   : > { %v1141_v51 = vmul.f32 %v2254_v18, %v2254_v18  ;;  %v2262_v27 = vadd.f32 %v995_v25, %v699_v54 }
 0x133   : > { %v1107_v28 = vadd.f32 %v2254_v18, %v1106_v50  ;;  %v1195_v29 = vadd.f32 %v1194_v22, %v1168_v26  ;;  %v1144_v38 = vmul.f32 %v2256_v23, %v2256_v23  ;;  %v1083_v60 = vsel %vm1055_vm2, %v2256_v23, 0.0 }
 0x134   : > { %v1081_v30 = vsel %vm1055_vm2, %v2262_v27, 0.0  ;;  %v1142_v33 = vmul.f32 %v2262_v27, %v2262_v27 }
 0x135   : > { %v1196_v34 = vadd.f32 %v1195_v29, %v1141_v51  ;;  %v1108_v36 = vadd.f32 %v1107_v28, %v1081_v30  ;;  %v1172_v4 = vsel %vm1055_vm2, %v1144_v38, 0.0 }
 0x136   : > { %v1170_v40 = vsel %vm1055_vm2, %v1142_v33, 0.0  ;;  %v1811_v41 = vpop.f32.mrb[24].mxu0 }
 0x137   : > { %v1109_v54 = vadd.f32 %v2249_v13, %v1108_v36  ;;  %v1197_v44 = vadd.f32 %v1196_v34, %v1170_v40  ;;  %v2277_v45 = vadd.f32 %v1811_v41, %v1781_v5  ;;  %v1008_v56 = vpop.f32.mrb[25].mxu0 }
 0x138   : > { %v2282_v62 = vadd.f32 %v1008_v56, %v712_v16  ;;  %v1812_v46 = vpop.f32.mrb[26].mxu0 }
 0x139   : > { %v1198_v63 = vadd.f32 %v1197_v44, %v1143_v42  ;;  %v1110_v0 = vadd.f32 %v1109_v54, %v1083_v60  ;;  %v2284_v1 = vadd.f32 %v1812_v46, %v1782_v49  ;;  %v1011_v2 = vpop.f32.mrb[27].mxu0  ;;  %v1147_v22 = vmul.f32 %v2277_v45, %v2277_v45 }
 0x13a   : > { %v1145_v5 = vmul.f32 %v2282_v62, %v2282_v62  ;;  %v2290_v6 = vadd.f32 %v1011_v2, %v715_v24 }
 0x13b   : > { %v1111_v9 = vadd.f32 %v2282_v62, %v1110_v0  ;;  %v1199_v10 = vadd.f32 %v1198_v63, %v1172_v4  ;;  %v1148_v49 = vmul.f32 %v2284_v1, %v2284_v1  ;;  %v1087_v25 = vsel %vm1055_vm2, %v2284_v1, 0.0 }
 0x13c   : > { %v1085_v12 = vsel %vm1055_vm2, %v2290_v6, 0.0  ;;  %v1146_v16 = vmul.f32 %v2290_v6, %v2290_v6 }
 0x13d   : > { %v1200_v17 = vadd.f32 %v1199_v10, %v1145_v5  ;;  %v1112_v48 = vadd.f32 %v1111_v9, %v1085_v12  ;;  %v1176_v28 = vsel %vm1055_vm2, %v1148_v49, 0.0 }
 0x13e   : > { %v1174_v21 = vsel %vm1055_vm2, %v1146_v16, 0.0 }
 0x13f   : > { %v1113_v50 = vadd.f32 %v2277_v45, %v1112_v48  ;;  %v1201_v24 = vadd.f32 %v1200_v17, %v1174_v21 }
 0x141   : > { %v1114_v26 = vadd.f32 %v1113_v50, %v1087_v25  ;;  %v1202_v51 = vadd.f32 %v1201_v24, %v1147_v22 }
 0x143   : > { %v1115_v29 = vrot.slane %v1114_v26, 4  ;;  %v1203_v30 = vadd.f32 %v1202_v51, %v1176_v28 }
 0x145   : > { %v1116_v33 = vadd.f32 %v1115_v29, %v1114_v26  ;;  %v1204_v34 = vrot.slane %v1203_v30, 4 }
 0x147   : > { %v1117_v36 = vrot.slane %v1116_v33, 2  ;;  %v1205_v38 = vadd.f32 %v1204_v34, %v1203_v30 }
 0x149   : > { %v1118_v40 = vadd.f32 %v1117_v36, %v1116_v33  ;;  %v1206_v41 = vrot.slane %v1205_v38, 2 }
 0x14b   : > { %v1119_v42 = vrot.slane %v1118_v40, 1  ;;  %v1207_v54 = vadd.f32 %v1206_v41, %v1205_v38 }
 0x14d   : > { %v1120_v44 = vadd.f32 %v1119_v42, %v1118_v40  ;;  %v1208_v56 = vrot.slane %v1207_v54, 1  ;;  %v1674_v42 = vld [vmem:[%s2409_s3] ss:$0 sm:$0xff] }
 0x14f   : > { %v1209_v60 = vadd.f32 %v1208_v56, %v1207_v54  ;;  %v2310_v46 = vmul.f32 0.0051020407, %v1120_v44 }
 0x151   : > { %v1211_v63 = vmul.f32 0.0051020407, %v1209_v60  ;;  %v1212_v53 = vmul.f32 %v2310_v46, %v2310_v46  ;;  %v1221_v0 = vsub.f32 %v2138_v11, %v2310_v46  ;;  %v1222_v2 = vsub.f32 %v2146_v19, %v2310_v46 }
 0x152   : > { %v1224_v5 = vsub.f32 %v2140_v15, %v2310_v46  ;;  %v1225_v9 = vsub.f32 %v2166_v35, %v2310_v46  ;;  %v1226_v10 = vsub.f32 %v2174_v43, %v2310_v46  ;;  %v1227_v12 = vsub.f32 %v2161_v32, %v2310_v46 }
 0x153   : > { %v1213_v4 = vsub.f32 %v1211_v63, %v1212_v53  ;;  %v1228_v16 = vsub.f32 %v2168_v39, %v2310_v46  ;;  %v1229_v11 = vsub.f32 %v2196_v7, %v2310_v46  ;;  %v1230_v17 = vsub.f32 %v2206_v20, %v2310_v46 }
 0x154   : > { %v1231_v15 = vsub.f32 %v2190_v3, %v2310_v46  ;;  %v1232_v35 = vsub.f32 %v2199_v14, %v2310_v46  ;;  %v1233_v43 = vsub.f32 %v2226_v37, %v2310_v46  ;;  %v1234_v32 = vsub.f32 %v2234_v58, %v2310_v46 }
 0x155   : > { %v1214_v19 = vmax.f32 %v1213_v4, 0.0  ;;  %v1235_v39 = vsub.f32 %v2221_v31, %v2310_v46  ;;  %v1236_v7 = vsub.f32 %v2228_v47, %v2310_v46  ;;  %v1237_v20 = vsub.f32 %v2254_v18, %v2310_v46 }
 0x156   : > { %v1238_v3 = vsub.f32 %v2262_v27, %v2310_v46  ;;  %v1239_v14 = vsub.f32 %v2249_v13, %v2310_v46  ;;  %v1240_v37 = vsub.f32 %v2256_v23, %v2310_v46  ;;  %v1241_v58 = vsub.f32 %v2282_v62, %v2310_v46  ;;  %v1245_v13 = vld [vmem:[%s2408_s2] sm:$0x1] }
 0x157   : > { %v1215_v48 = vadd.f32 1e-05, %v1214_v19  ;;  %v1242_v31 = vsub.f32 %v2290_v6, %v2310_v46  ;;  %v1243_v47 = vsub.f32 %v2277_v45, %v2310_v46  ;;  %v1244_v18 = vsub.f32 %v2284_v1, %v2310_v46 }
 0x158   : > { %v1249_v27 = vsub.s32 0, %v2104_v52  ;;  %v1217_v62 = vsub.f32 %v2111_v57, %v2310_v46  ;;  %v1218_v6 = vsub.f32 %v2116_v61, %v2310_v46  ;;  %v1219_v45 = vsub.f32 %v2109_v55, %v2310_v46 }
 0x159   : > { %1932 = vrsqrt.f32 %v1215_v48  ;;  %v1220_v1 = vsub.f32 %v2113_v59, %v2310_v46  ;;  %v1223_v22 = vsub.f32 %v2133_v8, %v2310_v46 }
 0x163   : > { %v1933_v23 = vpop.eup %1932 }
 0x164   : > { %v1246_v49 = vmul.f32 %v1933_v23, %v1245_v13 }
 0x166   : > { %v1250_v21 = vrot.slane %v1246_v49, %v1249_v27 }
 0x168   : > { %v1251_v50 = vmul.f32 %v1250_v21, %v1217_v62  ;;  %v1252_v52 = vmul.f32 %v1250_v21, %v1218_v6  ;;  %v1253_v24 = vmul.f32 %v1250_v21, %v1219_v45  ;;  %v1254_v25 = vmul.f32 %v1250_v21, %v1220_v1 }
 0x169   : > { %v1255_v26 = vmul.f32 %v1250_v21, %v1221_v0  ;;  %v1256_v51 = vmul.f32 %v1250_v21, %v1222_v2  ;;  %v1257_v57 = vmul.f32 %v1250_v21, %v1223_v22  ;;  %v1258_v28 = vmul.f32 %v1250_v21, %v1224_v5 }
 0x16a   : > { %v1259_v29 = vmul.f32 %v1250_v21, %v1225_v9  ;;  %v1260_v61 = vmul.f32 %v1250_v21, %v1226_v10  ;;  %v1261_v30 = vmul.f32 %v1250_v21, %v1227_v12  ;;  %v1262_v33 = vmul.f32 %v1250_v21, %v1228_v16 }
 0x16b   : > { %v1263_v55 = vmul.f32 %v1250_v21, %v1229_v11  ;;  %v1264_v34 = vmul.f32 %v1250_v21, %v1230_v17  ;;  %v1265_v36 = vmul.f32 %v1250_v21, %v1231_v15  ;;  %v1266_v59 = vmul.f32 %v1250_v21, %v1232_v35 }
 0x16c   : > { %v1267_v38 = vmul.f32 %v1250_v21, %v1233_v43  ;;  %v1268_v40 = vmul.f32 %v1250_v21, %v1234_v32  ;;  %v1269_v41 = vmul.f32 %v1250_v21, %v1235_v39  ;;  %v1270_v8 = vmul.f32 %v1250_v21, %v1236_v7 }
 0x16d   : > { %v1271_v54 = vmul.f32 %v1250_v21, %v1237_v20  ;;  %v1272_v44 = vmul.f32 %v1250_v21, %v1238_v3  ;;  %v1273_v56 = vmul.f32 %v1250_v21, %v1239_v14  ;;  %v1274_v60 = vmul.f32 %v1250_v21, %v1240_v37 }
 0x16e   : > { %v1275_v46 = vmul.f32 %v1250_v21, %v1241_v58  ;;  %v1276_v63 = vmul.f32 %v1250_v21, %v1242_v31  ;;  %v1277_v53 = vmul.f32 %v1250_v21, %v1243_v47  ;;  %v1278_v0 = vmul.f32 %v1250_v21, %v1244_v18 }
 0x16f   : > { %v1286_v2 = vadd.f32 %v1674_v42, %v1251_v50  ;;  %v1287_v4 = vadd.f32 %v1674_v42, %v1252_v52  ;;  %v1288_v5 = vadd.f32 %v1674_v42, %v1253_v24  ;;  %v1289_v9 = vadd.f32 %v1674_v42, %v1254_v25 }
 0x170   : > { %v1290_v10 = vadd.f32 %v1674_v42, %v1255_v26  ;;  %v1291_v12 = vadd.f32 %v1674_v42, %v1256_v51  ;;  %v1292_v16 = vadd.f32 %v1674_v42, %v1257_v57  ;;  %v1293_v11 = vadd.f32 %v1674_v42, %v1258_v28 }
 0x171   : > { %v1294_v19 = vadd.f32 %v1674_v42, %v1259_v29  ;;  %v1295_v17 = vadd.f32 %v1674_v42, %v1260_v61  ;;  %v1296_v15 = vadd.f32 %v1674_v42, %v1261_v30  ;;  %v1297_v35 = vadd.f32 %v1674_v42, %v1262_v33 }
 0x172   : > { %v1298_v43 = vadd.f32 %v1674_v42, %v1263_v55  ;;  %v1299_v32 = vadd.f32 %v1674_v42, %v1264_v34  ;;  %v1300_v39 = vadd.f32 %v1674_v42, %v1265_v36  ;;  %v1301_v7 = vadd.f32 %v1674_v42, %v1266_v59 }
 0x173   : > { %v1302_v48 = vadd.f32 %v1674_v42, %v1267_v38  ;;  %v1303_v20 = vadd.f32 %v1674_v42, %v1268_v40  ;;  %v1304_v3 = vadd.f32 %v1674_v42, %v1269_v41  ;;  %v1305_v14 = vadd.f32 %v1674_v42, %v1270_v8 }
 0x174   : > { %v1306_v37 = vadd.f32 %v1674_v42, %v1271_v54  ;;  %v1307_v58 = vadd.f32 %v1674_v42, %v1272_v44  ;;  %v1308_v31 = vadd.f32 %v1674_v42, %v1273_v56  ;;  %v1309_v47 = vadd.f32 %v1674_v42, %v1274_v60 }
 0x175   : > { %v1310_v18 = vadd.f32 %v1674_v42, %v1275_v46  ;;  %v1311_v13 = vadd.f32 %v1674_v42, %v1276_v63  ;;  %v1312_v27 = vadd.f32 %v1674_v42, %v1277_v53  ;;  %v1313_v23 = vadd.f32 %v1674_v42, %v1278_v0 }
 0x176   : > { %v1314_v49 = vmax.f32 %v1286_v2, 0.0  ;;  %v1315_v62 = vmax.f32 %v1287_v4, 0.0  ;;  %v1316_v6 = vmax.f32 %v1288_v5, 0.0  ;;  %v1317_v45 = vmax.f32 %v1289_v9, 0.0 }
 0x177   : > { %v1318_v1 = vmax.f32 %v1290_v10, 0.0  ;;  %v1319_v21 = vmax.f32 %v1291_v12, 0.0  ;;  %v1320_v22 = vmax.f32 %v1292_v16, 0.0  ;;  %v1321_v50 = vmax.f32 %v1293_v11, 0.0 }
 0x178   : > { %v1322_v52 = vmax.f32 %v1294_v19, 0.0  ;;  %v1323_v24 = vmax.f32 %v1295_v17, 0.0  ;;  %v1324_v25 = vmax.f32 %v1296_v15, 0.0  ;;  %v1325_v26 = vmax.f32 %v1297_v35, 0.0  ;;  %1342 = vst [vmem:[#allocation2] sm:$0xff] %v1314_v49  ;;  %1343 = vst [vmem:[#allocation2 + $0x8] sm:$0xff] %v1315_v62 }
 0x179   : > { %1344 = vst [vmem:[#allocation2 + $0x10] sm:$0xff] %v1316_v6  ;;  %1345 = vst [vmem:[#allocation2 + $0x18] sm:$0xff] %v1317_v45  ;;  %v1326_v51 = vmax.f32 %v1298_v43, 0.0  ;;  %v1327_v57 = vmax.f32 %v1299_v32, 0.0  ;;  %v1328_v28 = vmax.f32 %v1300_v39, 0.0  ;;  %v1329_v29 = vmax.f32 %v1301_v7, 0.0 }
 0x17a   : > { %1346 = vst [vmem:[#allocation2 + $0x20] sm:$0xff] %v1318_v1  ;;  %1347 = vst [vmem:[#allocation2 + $0x28] sm:$0xff] %v1319_v21  ;;  %v1330_v61 = vmax.f32 %v1302_v48, 0.0  ;;  %v1331_v30 = vmax.f32 %v1303_v20, 0.0  ;;  %v1332_v33 = vmax.f32 %v1304_v3, 0.0  ;;  %v1333_v55 = vmax.f32 %v1305_v14, 0.0 }
 0x17b   : > { %1348 = vst [vmem:[#allocation2 + $0x30] sm:$0xff] %v1320_v22  ;;  %1349 = vst [vmem:[#allocation2 + $0x38] sm:$0xff] %v1321_v50  ;;  %v1334_v34 = vmax.f32 %v1306_v37, 0.0  ;;  %v1335_v36 = vmax.f32 %v1307_v58, 0.0  ;;  %v1336_v59 = vmax.f32 %v1308_v31, 0.0  ;;  %v1337_v38 = vmax.f32 %v1309_v47, 0.0 }
 0x17c   : > { %1350 = vst [vmem:[#allocation2 + $0x40] sm:$0xff] %v1322_v52  ;;  %1351 = vst [vmem:[#allocation2 + $0x48] sm:$0xff] %v1323_v24  ;;  %v1338_v40 = vmax.f32 %v1310_v18, 0.0  ;;  %v1339_v41 = vmax.f32 %v1311_v13, 0.0  ;;  %v1340_v8 = vmax.f32 %v1312_v27, 0.0  ;;  %v1341_v42 = vmax.f32 %v1313_v23, 0.0 }
 0x17d   : > { %1352 = vst [vmem:[#allocation2 + $0x50] sm:$0xff] %v1324_v25  ;;  %1353 = vst [vmem:[#allocation2 + $0x58] sm:$0xff] %v1325_v26 }
 0x17e   : > { %1354 = vst [vmem:[#allocation2 + $0x60] sm:$0xff] %v1326_v51  ;;  %1355 = vst [vmem:[#allocation2 + $0x68] sm:$0xff] %v1327_v57 }
 0x17f   : > { %1356 = vst [vmem:[#allocation2 + $0x70] sm:$0xff] %v1328_v28  ;;  %1357 = vst [vmem:[#allocation2 + $0x78] sm:$0xff] %v1329_v29  ;;  %v1370_v54 = vld [vmem:[#allocation2] ss:$2 sm:$0x7f] }
 0x180   : > { %1358 = vst [vmem:[#allocation2 + $0x80] sm:$0xff] %v1330_v61  ;;  %1359 = vst [vmem:[#allocation2 + $0x88] sm:$0xff] %v1331_v30  ;;  %v1372_v44 = vld [vmem:[#allocation2 + $0x10] ss:$2 sm:$0x7f] }
 0x181   : > { %1360 = vst [vmem:[#allocation2 + $0x90] sm:$0xff] %v1332_v33  ;;  %1361 = vst [vmem:[#allocation2 + $0x98] sm:$0xff] %v1333_v55  ;;  %v1374_v56 = vld [vmem:[#allocation2 + $0x20] ss:$2 sm:$0x7f] }
 0x182   : > { %1362 = vst [vmem:[#allocation2 + $0xa0] sm:$0xff] %v1334_v34  ;;  %1363 = vst [vmem:[#allocation2 + $0xa8] sm:$0xff] %v1335_v36  ;;  %v1376_v60 = vld [vmem:[#allocation2 + $0x30] ss:$2 sm:$0x7f] }
 0x183   : > { %1364 = vst [vmem:[#allocation2 + $0xb0] sm:$0xff] %v1336_v59  ;;  %1365 = vst [vmem:[#allocation2 + $0xb8] sm:$0xff] %v1337_v38  ;;  %v1378_v46 = vld [vmem:[#allocation2 + $0x40] ss:$2 sm:$0x7f] }
 0x184   : > { %1366 = vst [vmem:[#allocation2 + $0xc0] sm:$0xff] %v1338_v40  ;;  %1367 = vst [vmem:[#allocation2 + $0xc8] sm:$0xff] %v1339_v41  ;;  %v1380_v63 = vld [vmem:[#allocation2 + $0x50] ss:$2 sm:$0x7f] }
 0x185   : > { %1368 = vst [vmem:[#allocation2 + $0xd0] sm:$0xff] %v1340_v8  ;;  %1369 = vst [vmem:[#allocation2 + $0xd8] sm:$0xff] %v1341_v42  ;;  %v1382_v53 = vld [vmem:[#allocation2 + $0x60] ss:$2 sm:$0x7f] }
 0x186   : > { %v1384_v0 = vld [vmem:[#allocation2 + $0x70] ss:$2 sm:$0x7f]  ;;  %v1398_v2 = vld [vmem:[#allocation2 + $0x1] ss:$2 sm:$0x7f] }
 0x187   : > { %v1400_v4 = vld [vmem:[#allocation2 + $0x11] ss:$2 sm:$0x7f]  ;;  %v1386_v5 = vld [vmem:[#allocation2 + $0x80] ss:$2 sm:$0x7f]  ;;  %v1425_v39 = vmax.f32 %v1370_v54, %v1398_v2 }
 0x188   : > { %v1388_v9 = vld [vmem:[#allocation2 + $0x90] ss:$2 sm:$0x7f]  ;;  %v1402_v16 = vld [vmem:[#allocation2 + $0x21] ss:$2 sm:$0x7f]  ;;  %v1426_v7 = vmax.f32 %v1372_v44, %v1400_v4 }
 0x189   : > { %v1390_v10 = vld [vmem:[#allocation2 + $0xa0] ss:$2 sm:$0x7f]  ;;  %v1404_v11 = vld [vmem:[#allocation2 + $0x31] ss:$2 sm:$0x7f]  ;;  %v1427_v3 = vmax.f32 %v1374_v56, %v1402_v16 }
 0x18a   : > { %v1392_v12 = vld [vmem:[#allocation2 + $0xb0] ss:$2 sm:$0x7f]  ;;  %v1406_v15 = vld [vmem:[#allocation2 + $0x41] ss:$2 sm:$0x7f]  ;;  %v1428_v14 = vmax.f32 %v1376_v60, %v1404_v11 }
 0x18b   : > { %v1394_v19 = vld [vmem:[#allocation2 + $0xc0] ss:$2 sm:$0x7f]  ;;  %v1408_v35 = vld [vmem:[#allocation2 + $0x51] ss:$2 sm:$0x7f]  ;;  %v1429_v37 = vmax.f32 %v1378_v46, %v1406_v15 }
 0x18c   : > { %v1396_v17 = vld [vmem:[#allocation2 + $0xd0] ss:$2 sm:$0x7f]  ;;  %v1410_v43 = vld [vmem:[#allocation2 + $0x61] ss:$2 sm:$0x7f]  ;;  %v1430_v47 = vmax.f32 %v1380_v63, %v1408_v35 }
 0x18d   : > { %v1412_v32 = vld [vmem:[#allocation2 + $0x71] ss:$2 sm:$0x7f]  ;;  %v1414_v48 = vld [vmem:[#allocation2 + $0x81] ss:$2 sm:$0x7f]  ;;  %v1431_v18 = vmax.f32 %v1382_v53, %v1410_v43 }
 0x18e   : > { %v1416_v20 = vld [vmem:[#allocation2 + $0x91] ss:$2 sm:$0x7f]  ;;  %v1418_v58 = vld [vmem:[#allocation2 + $0xa1] ss:$2 sm:$0x7f]  ;;  %v1432_v13 = vmax.f32 %v1384_v0, %v1412_v32  ;;  %v1433_v49 = vmax.f32 %v1386_v5, %v1414_v48 }
 0x18f   : > { %v1420_v31 = vld [vmem:[#allocation2 + $0xb1] ss:$2 sm:$0x7f]  ;;  %v1422_v27 = vld [vmem:[#allocation2 + $0xc1] ss:$2 sm:$0x7f]  ;;  %v1434_v62 = vmax.f32 %v1388_v9, %v1416_v20  ;;  %v1435_v6 = vmax.f32 %v1390_v10, %v1418_v58 }
 0x190   : > { %v1424_v23 = vld [vmem:[#allocation2 + $0xd1] ss:$2 sm:$0x7f]  ;;  %v1436_v45 = vmax.f32 %v1392_v12, %v1420_v31  ;;  %v1437_v1 = vmax.f32 %v1394_v19, %v1422_v27  ;;  %v1440_v22 = vsel %vm1439_vm3, %v1425_v39, -inf  ;;  %v1441_v50 = vsel %vm1439_vm3, %v1426_v7, -inf }
 0x191   : > { %v1438_v21 = vmax.f32 %v1396_v17, %v1424_v23  ;;  %v1442_v52 = vmax.f32 %v1440_v22, %v1441_v50  ;;  %v1443_v24 = vsel %vm1439_vm3, %v1427_v3, -inf  ;;  %v1444_v25 = vsel %vm1439_vm3, %v1428_v14, -inf }
 0x192   : > { %v1446_v26 = vsel %vm1439_vm3, %v1429_v37, -inf  ;;  %v1445_v51 = vmax.f32 %v1443_v24, %v1444_v25  ;;  %v1447_v57 = vsel %vm1439_vm3, %v1430_v47, -inf  ;;  %v1449_v28 = vsel %vm1439_vm3, %v1431_v18, -inf }
 0x193   : > { %v1450_v29 = vsel %vm1439_vm3, %v1432_v13, -inf  ;;  %v1448_v61 = vmax.f32 %v1446_v26, %v1447_v57  ;;  %v1452_v33 = vsel %vm1439_vm3, %v1433_v49, -inf  ;;  %v1453_v55 = vsel %vm1439_vm3, %v1434_v62, -inf  ;;  %1461 = vst [vmem:[%s262_s10] sm:$0x7f] %v1442_v52 }
 0x194   : > { %v1451_v30 = vmax.f32 %v1449_v28, %v1450_v29  ;;  %v1454_v34 = vmax.f32 %v1452_v33, %v1453_v55  ;;  %v1455_v36 = vsel %vm1439_vm3, %v1435_v6, -inf  ;;  %v1456_v59 = vsel %vm1439_vm3, %v1436_v45, -inf  ;;  %1462 = vst [vmem:[%s262_s10 + $0x8] sm:$0x7f] %v1445_v51 }
 0x195   : > { %v1458_v38 = vsel %vm1439_vm3, %v1437_v1, -inf  ;;  %v1457_v40 = vmax.f32 %v1455_v36, %v1456_v59  ;;  %v1459_v41 = vsel %vm1439_vm3, %v1438_v21, -inf  ;;  %1463 = vst [vmem:[%s262_s10 + $0x10] sm:$0x7f] %v1448_v61 }
 0x196   : > { %1464 = vst [vmem:[%s262_s10 + $0x18] sm:$0x7f] %v1451_v30  ;;  %v1460_v8 = vmax.f32 %v1458_v38, %v1459_v41  ;;  %1465 = vst [vmem:[%s262_s10 + $0x20] sm:$0x7f] %v1454_v34 }
 0x197   : > { %1466 = vst [vmem:[%s262_s10 + $0x28] sm:$0x7f] %v1457_v40 }
 0x198   : > { %1467 = vst [vmem:[%s262_s10 + $0x30] sm:$0x7f] %v1460_v8 }
 0x199 PF: > { %s14_s17 = sadd.s32 1, %s1956_s17   ;;  %s2411_s15 = smov %s1952_s16 }
 0x19a   : > { %p11_p5 = scmp.ge.s32.totalorder %s14_s17, 4   ;;  %s2412_s16 = smov %s2414_s18 }
 0x19c   :  { %13 = sbr.rel (!%p11_p5) target bundleno = 2 (0x2), region = 104 }

</bundles_post_ra>
